<compile_context>
chip_gen: v6e
topology: v6e:2x2x1
jax: 0.10.0
libtpu: 0.0.40
codegen_flags: <defaults>
</compile_context>

<pallas_src>
import functools

import jax
import jax.numpy as jnp
from jax.experimental import pallas as pl
from jax.experimental.pallas import tpu as pltpu


_VMEM_LIMIT_BYTES = 32 * 1024 * 1024    # safe on v5e/v6e (128 MiB phys) and v7x (64 MiB)
_FUSED_BLOCK_BYTES = 4 * 1024 * 1024    # (nb, C, HW) block; x4 (in+out, 2x buffered) = 16 MiB
_MAX_SAMPLES_PER_BLOCK = 8              # cap on static unroll of the tiny excitation math
_STREAM_TILE_BYTES = 4 * 1024 * 1024    # per (1, C, HW_TILE) block in the streaming path


# ----------------------------------------------------------------------------- kernels
def _se_fused_kernel(x_ref, w1_ref, b1_ref, w2_ref, b2_ref, o_ref, *, nb, inv_hw):
    # x_ref/o_ref: (nb, C, HW); w1: (Cr, C); b1: (Cr, 1); w2: (C, Cr); b2: (C, 1)
    w1 = w1_ref[...]
    b1 = b1_ref[...]
    w2 = w2_ref[...]
    b2 = b2_ref[...]
    # Static unrolled loop over the nb samples packed in this block (nb <= 8).  The
    # per-sample excitation is two tiny MXU matmuls + one EUP sigmoid; the dominant
    # cost (pool reduce + scale) is lane-dense VPU/XLU work over the (C, HW) slab.
    for n in range(nb):
        # Squeeze: global average pool over the lane (H*W) axis -> (C, 1) in f32.
        pooled = (jnp.sum(x_ref[n].astype(jnp.float32), axis=-1, keepdims=True)
                  * inv_hw)                                          # (C, 1)
        # Excitation: channels stay on the sublane axis; no relayout needed.
        h = jnp.maximum(
            jnp.dot(w1, pooled, preferred_element_type=jnp.float32) + b1, 0.0)  # (Cr, 1)
        g = jax.nn.sigmoid(
            jnp.dot(w2, h, preferred_element_type=jnp.float32) + b2)            # (C, 1)
        # Scale: re-read x (no long-lived f32 copy) and broadcast gate across lanes.
        o_ref[n] = x_ref[n] * g.astype(o_ref.dtype)


def _se_pool_gate_kernel(x_ref, w1_ref, b1_ref, w2_ref, b2_ref, s_ref, acc_ref,
                         *, hw, hw_tile, needs_mask, inv_hw):
    # grid = (N, T); x_ref: (C, hw_tile); s_ref: (C, 1) f32; acc_ref: (C, 1) f32 scratch.
    t = pl.program_id(1)

    @pl.when(t == 0)
    def _init():
        acc_ref[...] = jnp.zeros_like(acc_ref)

    x = x_ref[...].astype(jnp.float32)                          # (C, hw_tile)
    if needs_mask:  # static: only emitted when HW % hw_tile != 0 (ragged last tile)
        pos = t * hw_tile + jax.lax.broadcasted_iota(jnp.int32, x.shape, 1)
        x = jnp.where(pos < hw, x, 0.0)
    acc_ref[...] += jnp.sum(x, axis=-1, keepdims=True)          # partial pool

    @pl.when(t == pl.num_programs(1) - 1)
    def _finalize():
        pooled = acc_ref[...] * inv_hw                          # (C, 1)
        h = jnp.maximum(
            jnp.dot(w1_ref[...], pooled, preferred_element_type=jnp.float32) + b1_ref[...],
            0.0)                                                # (Cr, 1)
        s_ref[...] = jax.nn.sigmoid(
            jnp.dot(w2_ref[...], h, preferred_element_type=jnp.float32) + b2_ref[...])


def _se_scale_kernel(x_ref, s_ref, o_ref):
    # x_ref/o_ref: (C, hw_tile); s_ref: (C, 1) f32. Lane-dense elementwise scale.
    o_ref[...] = x_ref[...] * s_ref[...].astype(o_ref.dtype)


# ----------------------------------------------------------------------------- wrappers
def _largest_divisor_leq(n, k):
    k = max(1, min(n, k))
    for d in range(k, 0, -1):
        if n % d == 0:
            return d
    return 1


def _se_fused(x, w1, b1, w2, b2, nb):
    N, C, HW = x.shape
    cr = w1.shape[0]
    itemsize = x.dtype.itemsize
    w_bytes = sum(int(a.size) * a.dtype.itemsize for a in (w1, b1, w2, b2))
    cost = pl.CostEstimate(
        flops=int(2 * N * C * HW + 4 * N * C * cr),
        transcendentals=int(N * C),
        bytes_accessed=int(2 * N * C * HW * itemsize + w_bytes))

    return pl.pallas_call(
        functools.partial(_se_fused_kernel, nb=nb, inv_hw=1.0 / HW),
        out_shape=jax.ShapeDtypeStruct((N, C, HW), x.dtype),
        grid_spec=pltpu.PrefetchScalarGridSpec(
            num_scalar_prefetch=0,
            grid=(N // nb,),
            in_specs=[
                pl.BlockSpec((nb, C, HW), lambda i: (i, 0, 0)),
                pl.BlockSpec(w1.shape, lambda i: (0, 0)),
                pl.BlockSpec(b1.shape, lambda i: (0, 0)),
                pl.BlockSpec(w2.shape, lambda i: (0, 0)),
                pl.BlockSpec(b2.shape, lambda i: (0, 0)),
            ],
            out_specs=pl.BlockSpec((nb, C, HW), lambda i: (i, 0, 0)),
        ),
        compiler_params=pltpu.CompilerParams(
            dimension_semantics=("parallel",),          # shards sample blocks across TCs
            vmem_limit_bytes=_VMEM_LIMIT_BYTES),
        cost_estimate=cost,
    )(x, w1, b1, w2, b2)


def _pick_hw_tile(C, HW, itemsize, budget=_STREAM_TILE_BYTES):
    max_lanes = max(128, (budget // max(1, C * itemsize)) // 128 * 128)
    if HW <= max_lanes:
        return HW            # full-extent block: (8,128) divisibility is waived
    return max_lanes         # multiple of 128, < HW


def _se_streaming(x, w1, b1, w2, b2, hw_tile=None):
    N, C, HW = x.shape
    cr = w1.shape[0]
    itemsize = x.dtype.itemsize
    if hw_tile is None:
        hw_tile = _pick_hw_tile(C, HW, itemsize)
    hw_tile = min(hw_tile, HW)
    num_t = pl.cdiv(HW, hw_tile)
    needs_mask = (HW % hw_tile) != 0
    w_bytes = sum(int(a.size) * a.dtype.itemsize for a in (w1, b1, w2, b2))

    pool_cost = pl.CostEstimate(
        flops=int(N * C * HW + 4 * N * C * cr),
        transcendentals=int(N * C),
        bytes_accessed=int(N * C * HW * itemsize + w_bytes + N * C * 4))
    scale_cost = pl.CostEstimate(
        flops=int(N * C * HW),
        transcendentals=0,
        bytes_accessed=int(2 * N * C * HW * itemsize + N * C * 4))

    # Pass 1: streaming average-pool + excitation gate (gate emitted on the last tile).
    s = pl.pallas_call(
        functools.partial(_se_pool_gate_kernel, hw=HW, hw_tile=hw_tile,
                          needs_mask=needs_mask, inv_hw=1.0 / HW),
        out_shape=jax.ShapeDtypeStruct((N, C, 1), jnp.float32),
        grid_spec=pltpu.PrefetchScalarGridSpec(
            num_scalar_prefetch=0,
            grid=(N, num_t),
            in_specs=[
                pl.BlockSpec((None, C, hw_tile), lambda n, t: (n, 0, t)),
                pl.BlockSpec(w1.shape, lambda n, t: (0, 0)),
                pl.BlockSpec(b1.shape, lambda n, t: (0, 0)),
                pl.BlockSpec(w2.shape, lambda n, t: (0, 0)),
                pl.BlockSpec(b2.shape, lambda n, t: (0, 0)),
            ],
            out_specs=pl.BlockSpec((None, C, 1), lambda n, t: (n, 0, 0)),
            scratch_shapes=[pltpu.VMEM((C, 1), jnp.float32)],
        ),
        compiler_params=pltpu.CompilerParams(
            dimension_semantics=("parallel", "arbitrary"),
            vmem_limit_bytes=_VMEM_LIMIT_BYTES),
        cost_estimate=pool_cost,
    )(x, w1, b1, w2, b2)

    # Pass 2: streaming scale with lane-dense output tiles.
    out = pl.pallas_call(
        _se_scale_kernel,
        out_shape=jax.ShapeDtypeStruct((N, C, HW), x.dtype),
        grid_spec=pltpu.PrefetchScalarGridSpec(
            num_scalar_prefetch=0,
            grid=(N, num_t),
            in_specs=[
                pl.BlockSpec((None, C, hw_tile), lambda n, t: (n, 0, t)),
                pl.BlockSpec((None, C, 1), lambda n, t: (n, 0, 0)),
            ],
            out_specs=pl.BlockSpec((None, C, hw_tile), lambda n, t: (n, 0, t)),
        ),
        compiler_params=pltpu.CompilerParams(
            dimension_semantics=("parallel", "parallel"),
            vmem_limit_bytes=_VMEM_LIMIT_BYTES),
        cost_estimate=scale_cost,
    )(x, s)
    return out


def se_forward(x_nchw, w1, b1, w2, b2, *, force_streaming=False, hw_tile=None):
    """x_nchw: (N, C, H, W). Returns (N, C, H, W). Weights in PyTorch conv layout."""
    N, C, H, W = x_nchw.shape
    HW = H * W
    x = x_nchw.reshape(N, C, HW)                 # free reshape: NO transpose, no HBM pass
    per_sample_bytes = C * HW * x.dtype.itemsize
    if (not force_streaming) and per_sample_bytes <= _FUSED_BLOCK_BYTES:
        # Pack as many samples per block as fit the budget (largest divisor of N, <= 8)
        # so each grid step moves a multi-MiB slab and grid overhead stays hidden.
        nb_max = min(_MAX_SAMPLES_PER_BLOCK,
                     max(1, _FUSED_BLOCK_BYTES // max(1, per_sample_bytes)))
        nb = _largest_divisor_leq(N, nb_max)
        out = _se_fused(x, w1, b1, w2, b2, nb)   # x read once from HBM
    else:
        out = _se_streaming(x, w1, b1, w2, b2, hw_tile=hw_tile)
    return out.reshape(N, C, H, W)               # free reshape back


# ----------------------------------------------------------------------------- test
def init_se_params(key, ch):
    """Synthetic params; same layout as the PyTorch module's conv weights:
    w1 = conv1.weight[:, :, 0, 0] (cr, ch), b1 = conv1.bias[:, None] (cr, 1),
    w2 = conv2.weight[:, :, 0, 0] (ch, cr), b2 = conv2.bias[:, None] (ch, 1)."""
    cr = ch // 16
    k1, k2, k3, k4 = jax.random.split(key, 4)
    w1 = jax.random.normal(k1, (cr, ch), jnp.float32) * 0.1
    b1 = jax.random.normal(k2, (cr, 1), jnp.float32) * 0.1
    w2 = jax.random.normal(k3, (ch, cr), jnp.float32) * 0.1
    b2 = jax.random.normal(k4, (ch, 1), jnp.float32) * 0.1
    return w1, b1, w2, b2


def se_reference(x_nchw, w1, b1, w2, b2):
    """Plain-JAX reference mirroring the PyTorch module."""
    pooled = jnp.mean(x_nchw, axis=(2, 3))                       # (N, C)
    h = jnp.maximum(pooled @ w1.T + b1[:, 0], 0.0)               # (N, Cr)
    s = jax.nn.sigmoid(h @ w2.T + b2[:, 0])                      # (N, C)
    return x_nchw * s[:, :, None, None]


if __name__ == "__main__":
    key = jax.random.PRNGKey(0)
    kx, kp = jax.random.split(key)

    N, C, H, W = 2, 32, 16, 16          # C >= 16 so ch // 16 >= 1
    x = jax.random.normal(kx, (N, C, H, W), jnp.float32)
    w1, b1, w2, b2 = init_se_params(kp, C)
    ref = se_reference(x, w1, b1, w2, b2)

    # Fused single-pass path (per-sample slabs packed into one VMEM block, nb=2 here).
    out = jax.block_until_ready(se_forward(x, w1, b1, w2, b2))
    assert out.shape == x.shape
    assert jnp.allclose(out, ref, atol=1e-5, rtol=1e-5)

    # Fused path with a larger batch (exercises nb > 2 sample packing).
    x4 = jax.random.normal(kx, (4, C, 8, 8), jnp.float32)
    ref4 = se_reference(x4, w1, b1, w2, b2)
    out4 = jax.block_until_ready(se_forward(x4, w1, b1, w2, b2))
    assert jnp.allclose(out4, ref4, atol=1e-5, rtol=1e-5)

    # Streaming pool/scale path, forced, with HW tiled into 128-lane blocks.
    out_s = jax.block_until_ready(
        se_forward(x, w1, b1, w2, b2, force_streaming=True, hw_tile=128))
    assert jnp.allclose(out_s, ref, atol=1e-5, rtol=1e-5)

    # Streaming path with a ragged last tile (12*12 = 144 is not a multiple of 128).
    x2 = jax.random.normal(kx, (N, C, 12, 12), jnp.float32)
    ref2 = se_reference(x2, w1, b1, w2, b2)
    out2 = jax.block_until_ready(
        se_forward(x2, w1, b1, w2, b2, force_streaming=True, hw_tile=128))
    assert jnp.allclose(out2, ref2, atol=1e-5, rtol=1e-5)

    print("KERNEL_OK")
</pallas_src>

<mosaic_0001>
module attributes {stable_mosaic.version = 11 : i64} {
  func.func @_se_fused_kernel(%arg0: i32, %arg1: memref<2x32x256xf32, #tpu.memory_space<vmem>>, %arg2: memref<2x32xf32, #tpu.memory_space<vmem>>, %arg3: memref<2x1xf32, #tpu.memory_space<vmem>>, %arg4: memref<32x2xf32, #tpu.memory_space<vmem>>, %arg5: memref<32x1xf32, #tpu.memory_space<vmem>>, %arg6: memref<2x32x256xf32, #tpu.memory_space<vmem>>) attributes {dimension_semantics = [#tpu.dimension_semantics<parallel>], iteration_bounds = array<i64: 1>, scalar_prefetch = 0 : i64, scratch_operands = 0 : i64, tpu.core_type = #tpu.core_type<tc>, window_params = [{transform_indices = @transform_0, window_bounds = array<i64: 2, 32, 256>}, {pipeline_mode = #tpu.pipeline_mode<synchronous>, transform_indices = @transform_1, window_bounds = array<i64: 2, 32>}, {pipeline_mode = #tpu.pipeline_mode<synchronous>, transform_indices = @transform_2, window_bounds = array<i64: 2, 1>}, {pipeline_mode = #tpu.pipeline_mode<synchronous>, transform_indices = @transform_3, window_bounds = array<i64: 32, 2>}, {pipeline_mode = #tpu.pipeline_mode<synchronous>, transform_indices = @transform_4, window_bounds = array<i64: 32, 1>}, {transform_indices = @transform_5, window_bounds = array<i64: 2, 32, 256>}]} {
    %c0 = arith.constant 0 : index
    %c0_0 = arith.constant 0 : index
    %0 = vector.load %arg2[%c0, %c0_0] : memref<2x32xf32, #tpu.memory_space<vmem>>, vector<2x32xf32>
    %c0_1 = arith.constant 0 : index
    %c0_2 = arith.constant 0 : index
    %1 = vector.load %arg3[%c0_1, %c0_2] : memref<2x1xf32, #tpu.memory_space<vmem>>, vector<2x1xf32>
    %c0_3 = arith.constant 0 : index
    %c0_4 = arith.constant 0 : index
    %2 = vector.load %arg4[%c0_3, %c0_4] : memref<32x2xf32, #tpu.memory_space<vmem>>, vector<32x2xf32>
    %c0_5 = arith.constant 0 : index
    %c0_6 = arith.constant 0 : index
    %3 = vector.load %arg5[%c0_5, %c0_6] : memref<32x1xf32, #tpu.memory_space<vmem>>, vector<32x1xf32>
    %c0_7 = arith.constant 0 : index
    %c0_8 = arith.constant 0 : index
    %c0_9 = arith.constant 0 : index
    %4 = vector.load %arg1[%c0_7, %c0_8, %c0_9] : memref<2x32x256xf32, #tpu.memory_space<vmem>>, vector<1x32x256xf32>
    %5 = vector.shape_cast %4 : vector<1x32x256xf32> to vector<32x256xf32>
    %cst = arith.constant dense<0.000000e+00> : vector<32xf32>
    %6 = vector.multi_reduction <add>, %5, %cst [1] : vector<32x256xf32> to vector<32xf32>
    %7 = vector.shape_cast %6 : vector<32xf32> to vector<32x1xf32>
    %cst_10 = arith.constant 3.906250e-03 : f32
    %8 = vector.broadcast %cst_10 : f32 to vector<32x1xf32>
    %9 = arith.mulf %7, %8 : vector<32x1xf32>
    %cst_11 = arith.constant dense<0.000000e+00> : vector<2x1xf32>
    %10 = tpu.matmul %0, %9, %cst_11 {dimension_numbers = #tpu.dot_dimension_numbers<[1], [0], [0], [1], [0, 0, 1, 1], [], []>} : vector<2x32xf32>, vector<32x1xf32>, vector<2x1xf32> -> vector<2x1xf32>
    %11 = arith.addf %10, %1 : vector<2x1xf32>
    %cst_12 = arith.constant 0.000000e+00 : f32
    %12 = vector.broadcast %cst_12 : f32 to vector<2x1xf32>
    %13 = arith.maximumf %11, %12 : vector<2x1xf32>
    %cst_13 = arith.constant dense<0.000000e+00> : vector<32x1xf32>
    %14 = tpu.matmul %2, %13, %cst_13 {dimension_numbers = #tpu.dot_dimension_numbers<[1], [0], [0], [1], [0, 0, 1, 1], [], []>} : vector<32x2xf32>, vector<2x1xf32>, vector<32x1xf32> -> vector<32x1xf32>
    %15 = arith.addf %14, %3 : vector<32x1xf32>
    %16 = arith.negf %15 : vector<32x1xf32>
    %17 = math.exp %16 : vector<32x1xf32>
    %cst_14 = arith.constant 1.000000e+00 : f32
    %18 = vector.broadcast %cst_14 : f32 to vector<32x1xf32>
    %19 = arith.addf %18, %17 : vector<32x1xf32>
    %20 = arith.divf %18, %19 : vector<32x1xf32>
    %c0_15 = arith.constant 0 : index
    %c0_16 = arith.constant 0 : index
    %c0_17 = arith.constant 0 : index
    %21 = vector.load %arg1[%c0_15, %c0_16, %c0_17] : memref<2x32x256xf32, #tpu.memory_space<vmem>>, vector<1x32x256xf32>
    %22 = vector.shape_cast %21 : vector<1x32x256xf32> to vector<32x256xf32>
    %23 = vector.broadcast %20 : vector<32x1xf32> to vector<32x256xf32>
    %24 = arith.mulf %22, %23 : vector<32x256xf32>
    %c0_18 = arith.constant 0 : index
    %c0_19 = arith.constant 0 : index
    %c0_20 = arith.constant 0 : index
    %25 = vector.load %arg6[%c0_18, %c0_19, %c0_20] : memref<2x32x256xf32, #tpu.memory_space<vmem>>, vector<1x32x256xf32>
    %26 = vector.shape_cast %25 : vector<1x32x256xf32> to vector<32x256xf32>
    %27 = vector.shape_cast %24 : vector<32x256xf32> to vector<1x32x256xf32>
    tpu.vector_store %arg6[%c0_18, %c0_19, %c0_20], %27 {strides = array<i32>} : memref<2x32x256xf32, #tpu.memory_space<vmem>>, vector<1x32x256xf32>,
    %c1 = arith.constant 1 : index
    %c0_21 = arith.constant 0 : index
    %c0_22 = arith.constant 0 : index
    %28 = vector.load %arg1[%c1, %c0_21, %c0_22] : memref<2x32x256xf32, #tpu.memory_space<vmem>>, vector<1x32x256xf32>
    %29 = vector.shape_cast %28 : vector<1x32x256xf32> to vector<32x256xf32>
    %cst_23 = arith.constant dense<0.000000e+00> : vector<32xf32>
    %30 = vector.multi_reduction <add>, %29, %cst_23 [1] : vector<32x256xf32> to vector<32xf32>
    %31 = vector.shape_cast %30 : vector<32xf32> to vector<32x1xf32>
    %cst_24 = arith.constant 3.906250e-03 : f32
    %32 = vector.broadcast %cst_24 : f32 to vector<32x1xf32>
    %33 = arith.mulf %31, %32 : vector<32x1xf32>
    %cst_25 = arith.constant dense<0.000000e+00> : vector<2x1xf32>
    %34 = tpu.matmul %0, %33, %cst_25 {dimension_numbers = #tpu.dot_dimension_numbers<[1], [0], [0], [1], [0, 0, 1, 1], [], []>} : vector<2x32xf32>, vector<32x1xf32>, vector<2x1xf32> -> vector<2x1xf32>
    %35 = arith.addf %34, %1 : vector<2x1xf32>
    %cst_26 = arith.constant 0.000000e+00 : f32
    %36 = vector.broadcast %cst_26 : f32 to vector<2x1xf32>
    %37 = arith.maximumf %35, %36 : vector<2x1xf32>
    %cst_27 = arith.constant dense<0.000000e+00> : vector<32x1xf32>
    %38 = tpu.matmul %2, %37, %cst_27 {dimension_numbers = #tpu.dot_dimension_numbers<[1], [0], [0], [1], [0, 0, 1, 1], [], []>} : vector<32x2xf32>, vector<2x1xf32>, vector<32x1xf32> -> vector<32x1xf32>
    %39 = arith.addf %38, %3 : vector<32x1xf32>
    %40 = arith.negf %39 : vector<32x1xf32>
    %41 = math.exp %40 : vector<32x1xf32>
    %cst_28 = arith.constant 1.000000e+00 : f32
    %42 = vector.broadcast %cst_28 : f32 to vector<32x1xf32>
    %43 = arith.addf %42, %41 : vector<32x1xf32>
    %44 = arith.divf %42, %43 : vector<32x1xf32>
    %c1_29 = arith.constant 1 : index
    %c0_30 = arith.constant 0 : index
    %c0_31 = arith.constant 0 : index
    %45 = vector.load %arg1[%c1_29, %c0_30, %c0_31] : memref<2x32x256xf32, #tpu.memory_space<vmem>>, vector<1x32x256xf32>
    %46 = vector.shape_cast %45 : vector<1x32x256xf32> to vector<32x256xf32>
    %47 = vector.broadcast %44 : vector<32x1xf32> to vector<32x256xf32>
    %48 = arith.mulf %46, %47 : vector<32x256xf32>
    %c1_32 = arith.constant 1 : index
    %c0_33 = arith.constant 0 : index
    %c0_34 = arith.constant 0 : index
    %49 = vector.load %arg6[%c1_32, %c0_33, %c0_34] : memref<2x32x256xf32, #tpu.memory_space<vmem>>, vector<1x32x256xf32>
    %50 = vector.shape_cast %49 : vector<1x32x256xf32> to vector<32x256xf32>
    %51 = vector.shape_cast %48 : vector<32x256xf32> to vector<1x32x256xf32>
    tpu.vector_store %arg6[%c1_32, %c0_33, %c0_34], %51 {strides = array<i32>} : memref<2x32x256xf32, #tpu.memory_space<vmem>>, vector<1x32x256xf32>,
    return
  }
  func.func @transform_0(%arg0: i32) -> (i32, i32, i32) {
    %c0_i32 = arith.constant 0 : i32
    %c0_i32_0 = arith.constant 0 : i32
    %c0_i32_1 = arith.constant 0 : i32
    return %arg0, %c0_i32, %c0_i32_0 : i32, i32, i32
  }
  func.func @transform_1(%arg0: i32) -> (i32, i32) {
    %c0_i32 = arith.constant 0 : i32
    %c0_i32_0 = arith.constant 0 : i32
    %c0_i32_1 = arith.constant 0 : i32
    return %c0_i32, %c0_i32_0 : i32, i32
  }
  func.func @transform_2(%arg0: i32) -> (i32, i32) {
    %c0_i32 = arith.constant 0 : i32
    %c0_i32_0 = arith.constant 0 : i32
    %c0_i32_1 = arith.constant 0 : i32
    return %c0_i32, %c0_i32_0 : i32, i32
  }
  func.func @transform_3(%arg0: i32) -> (i32, i32) {
    %c0_i32 = arith.constant 0 : i32
    %c0_i32_0 = arith.constant 0 : i32
    %c0_i32_1 = arith.constant 0 : i32
    return %c0_i32, %c0_i32_0 : i32, i32
  }
  func.func @transform_4(%arg0: i32) -> (i32, i32) {
    %c0_i32 = arith.constant 0 : i32
    %c0_i32_0 = arith.constant 0 : i32
    %c0_i32_1 = arith.constant 0 : i32
    return %c0_i32, %c0_i32_0 : i32, i32
  }
  func.func @transform_5(%arg0: i32) -> (i32, i32, i32) {
    %c0_i32 = arith.constant 0 : i32
    %c0_i32_0 = arith.constant 0 : i32
    %c0_i32_1 = arith.constant 0 : i32
    return %arg0, %c0_i32, %c0_i32_0 : i32, i32, i32
  }
}

</mosaic_0001>

<bundles_post_ra>
// kernel: tpu_custom_call.1
= control target key start
LH: loop header
LB: loop body
LE: loop exit
PB: predicated region body
PF: predicated region fallthrough
CT: control target
= control target key end

     0   :  { %10 = vsyncpa [#allocation3], 0  ;;  %s920_s0 = inlined_call_operand.hbm [shape: f32[2,32,256], index: 0, kind: input, shape index: {}]   ;;  %s921_s1 = inlined_call_operand.vmem [shape: f32[2,32], index: 1, kind: input, shape index: {}]   ;;  %s922_s2 = inlined_call_operand.vmem [shape: f32[2,1], index: 2, kind: input, shape index: {}]   ;;  %s923_s3 = inlined_call_operand.vmem [shape: f32[32,2], index: 3, kind: input, shape index: {}]   ;;  %s924_s4 = inlined_call_operand.vmem [shape: f32[32,1], index: 4, kind: input, shape index: {}]   ;;  %s925_s5 = inlined_call_operand.hbm [shape: f32[2,32,256], index: 5, kind: output, shape index: {}]  }
   0x1   :  { %11 = vsyncpa [#allocation4], 0  ;;  %s733_s18 = smov [#allocation2]  }
   0x2   :  { %s17_s19 = sshll.u32 %s733_s18, 4  ;;  %s18_s19 = int_to_ptr.vmem [resolvable:$true] %s17_s19 }
   0x3   :  { %s697_s20 = scalar_lea.vmem %s18_s19, 2048  ;;  %p702_p1 = scmp.lt.s32.totalorder %s18_s19, %s18_s19 }
   0x4   :  { %p698_p0 = scmp.ne.s32.totalorder %s18_s19, %s697_s20  ;;  %p703_p2 = scmp.lt.s32.totalorder %s697_s20, %s697_s20 }
   0x6   :  { %p704_p3 = por %p703_p2, %p702_p1 }
   0x8   :  { %p705_p4 = pnand %p704_p3, %p698_p0 }
   0xa   :  { %708 = shalt.err (!%p705_p4)
}
   0xb   :  { %s734_s21 = smov 256   ;;  %s735_s22 = smov 16  }
   0xc   :  { %23 = dma.hbm_to_vmem [thread:$0]  %s920_s0, 2048, %s18_s19, [#allocation3], %s734_s21, %s734_s21, %s735_s22  }
   0xd   :  { %729 = dma.done.wait [#allocation3], 2048  }
   0xe   :  { %730 = vsyncadd [#allocation3], 4294965248  ;;  %v776_v0 = vld [vmem:[#allocation2 + $0x30] sm:$0xff]  ;;  %v778_v1 = vld [vmem:[#allocation2 + $0x38] sm:$0xff]  ;;  %v736_v12 = vmov 0.0   ;;  %vm737_vm0 = vmmov 0  }
   0xf   :  { %v780_v2 = vld [vmem:[#allocation2 + $0x20] sm:$0xff]  ;;  %v62_v3 = vadd.f32 %v778_v1, %v776_v0  ;;  %v784_v4 = vld [vmem:[#allocation2 + $0x28] sm:$0xff]  ;;  %v786_v5 = vld [vmem:[#allocation2 + $0x10] sm:$0xff]  ;;  %608 = vmatprep.subr.mxu0 %v736_v12  ;;  %616 = vmatprep.mubr.msk.f32.mxu0 %vm737_vm0, %v736_v12  ;;  %vm69_vm1 = vcmask 261120   ;;  %vm144_vm2 = vcmask 15360   ;;  %vm157_vm3 = vcmask 1041408  }
  0x10   :  { %v788_v6 = vld [vmem:[#allocation2 + $0x18] sm:$0xff]  ;;  %v792_v8 = vld [vmem:[#allocation2] sm:$0xff]  ;;  %v794_v9 = vld [vmem:[#allocation2 + $0x8] sm:$0xff]  ;;  %v59_v10 = vadd.f32 %v784_v4, %v780_v2  ;;  %v738_v51 = vmov 0  }
  0x11   :  { %v56_v7 = vadd.f32 %v788_v6, %v786_v5  ;;  %63 = vadd.xlane.f32.xlu0 %v62_v3  ;;  %v53_v11 = vadd.f32 %v794_v9, %v792_v8  ;;  %v803_v13 = vld [vmem:[#allocation2 + $0x70] sm:$0xff]  ;;  %v805_v14 = vld [vmem:[#allocation2 + $0x78] sm:$0xff]  ;;  %v807_v15 = vld [vmem:[#allocation2 + $0x60] sm:$0xff]  ;;  %656 = vset.pattern.permute.xlu1 %v738_v51 }
  0x12   :  { %v324_v16 = vadd.f32 %v805_v14, %v803_v13  ;;  %v811_v17 = vld [vmem:[#allocation2 + $0x68] sm:$0xff]  ;;  %v813_v18 = vld [vmem:[#allocation2 + $0x50] sm:$0xff]  ;;  %v815_v19 = vld [vmem:[#allocation2 + $0x58] sm:$0xff]  ;;  %655 = vset.pattern.permute.xlu0 %v738_v51 }
  0x13   :  { %57 = vadd.xlane.f32.xlu1 %v56_v7  ;;  %v321_v20 = vadd.f32 %v811_v17, %v807_v15  ;;  %v819_v21 = vld [vmem:[#allocation2 + $0x40] sm:$0xff]  ;;  %v821_v22 = vld [vmem:[#allocation2 + $0x48] sm:$0xff]  ;;  %v318_v23 = vadd.f32 %v815_v19, %v813_v18  ;;  %v39_v45 = vld [vmem:[%s923_s3 + $0x10] sm:$0xff] }
  0x14   :  { %v315_v24 = vadd.f32 %v821_v22, %v819_v21  ;;  %v35_v33 = vld [vmem:[%s921_s1] sm:$0x3]  ;;  %v38_v43 = vld [vmem:[%s923_s3 + $0x8] sm:$0xff]  ;;  %v40_v49 = vld [vmem:[%s923_s3 + $0x18] sm:$0xff] }
  0x15   :  { %60 = vadd.xlane.f32.xlu0 %v59_v10  ;;  %v37_v34 = vld [vmem:[%s923_s3] sm:$0xff]  ;;  %v867_v52 = vld [vmem:[%s924_s4 + $0x8] sm:$0xff]  ;;  %v878_v57 = vld [vmem:[%s924_s4 + $0x18] sm:$0xff] }
  0x16   :  { %621 = vmatprep.mubr.msk.f32.mxu1 %vm144_vm2, %v37_v34  ;;  %v36_v35 = vld [vmem:[%s922_s2] sm:$0x3]  ;;  %v884_v61 = vld [vmem:[%s924_s4 + $0x10] sm:$0xff] }
  0x17   :  { %54 = vadd.xlane.f32.xlu1 %v53_v11  ;;  %v872_v54 = vld [vmem:[%s924_s4] sm:$0xff]  ;;  %s739_s4 = smov [#allocation5]  }
  0x18   :  { %s556_s16 = sshll.u32 %s739_s4, 4  ;;  %s557_s16 = int_to_ptr.vmem [resolvable:$true] %s556_s16 }
  0x19   :  { %325 = vadd.xlane.f32.xlu0 %v324_v16  ;;  %s709_s17 = scalar_lea.vmem %s557_s16, 2048  ;;  %p714_p6 = scmp.lt.s32.totalorder %s557_s16, %s557_s16 }
  0x1a   :  { %p710_p5 = scmp.ne.s32.totalorder %s557_s16, %s709_s17  ;;  %p715_p7 = scmp.lt.s32.totalorder %s709_s17, %s709_s17 }
  0x1b   :  { %322 = vadd.xlane.f32.xlu1 %v321_v20 }
  0x1c   :  { %p716_p8 = por %p715_p7, %p714_p6 }
  0x1d   :  { %319 = vadd.xlane.f32.xlu0 %v318_v23 }
  0x1e   :  { %p717_p9 = pnand %p716_p8, %p710_p5 }
  0x1f   :  { %316 = vadd.xlane.f32.xlu1 %v315_v24 }
  0x9a   :  { %v64_v25 = vpop.xlane.xlu0 %63 }
  0x9b   :  { %v68_v26 = vmul.f32 0.00390625, %v64_v25 }
  0x9c   :  { %v58_v27 = vpop.xlane.xlu1 %57 }
  0x9d   :  { %609 = vmatpush3.msra.mxu0 %v68_v26  ;;  %v66_v31 = vmul.f32 0.00390625, %v58_v27 }
  0x9e   :  { %v61_v28 = vpop.xlane.xlu0 %60  ;;  %610 = vmatprep.subr.mxu0 %v736_v12 }
  0x9f   :  { %v67_v29 = vmul.f32 0.00390625, %v61_v28 }
  0xa0   :  { %v55_v30 = vpop.xlane.xlu1 %54 }
  0xa1   :  { %611 = vmatpush3.msra.mxu0 %v67_v29  ;;  %v65_v32 = vmul.f32 0.00390625, %v55_v30 }
  0xa2   :  { %612 = vmatprep.subr.mxu0 %v736_v12  ;;  %v326_v36 = vpop.xlane.xlu0 %325 }
  0xa3   :  { %613 = vmatpush3.msra.mxu0 %v66_v31  ;;  %v330_v42 = vmul.f32 0.00390625, %v326_v36 }
  0xa4   :  { %614 = vmatprep.subr.mxu0 %v736_v12  ;;  %v323_v39 = vpop.xlane.xlu1 %322 }
  0xa5   :  { %615 = vmatpush3.msra.mxu0 %v65_v32  ;;  %v329_v46 = vmul.f32 0.00390625, %v323_v39 }
  0xa6   :  { %617 = vmatmul.mubr.msk.f32.vlgmr.msra.gmra.mxu0 %vm69_vm1, %v35_v33  ;;  %v320_v44 = vpop.xlane.xlu0 %319 }
  0xa7   :  { %640 = vmatprep.mubr.msk.f32.mxu0 %vm144_vm2, %v37_v34  ;;  %v328_v48 = vmul.f32 0.00390625, %v320_v44 }
  0xa8   :  { %v317_v47 = vpop.xlane.xlu1 %316 }
  0xa9   :  { %v327_v50 = vmul.f32 0.00390625, %v317_v47 }
 0x166   :  { %v139_v37 = vpop.f32.mrf.mxu0 }
 0x167   :  { %v140_v38 = vadd.f32 %v139_v37, %v36_v35 }
 0x168   :  { %v618_v40 = vpop.f32.mrf.mxu0 }
 0x169   :  { %v143_v41 = vmax.f32 %v140_v38, 0.0 }
 0x16b   :  { %619 = vmatprep.subr.msk.mxu1 %vm157_vm3, %v143_v41 }
 0x16c   :  { %620 = vmatpush3.msk.msra.mxu1 %vm157_vm3, %v143_v41 }
 0x16d   :  { %622 = vmatmul.mubr.msk.f32.vlgmr.msra.gmra.mxu1 %vm144_vm2, %v38_v43  ;;  %627 = vmatprep.subr.mxu1 %v736_v12 }
 0x16e   :  { %628 = vmatpush3.msra.mxu1 %v330_v42  ;;  %624 = vmatprep.mubr.msk.f32.mxu1 %vm144_vm2, %v39_v45 }
 0x16f   :  { %629 = vmatprep.subr.mxu1 %v736_v12 }
 0x170   :  { %630 = vmatpush3.msra.mxu1 %v329_v46 }
 0x171   :  { %625 = vmatmul.mubr.msk.f32.gmra.mxu1 %vm144_vm2, %v40_v49  ;;  %631 = vmatprep.subr.mxu1 %v736_v12 }
 0x172   :  { %632 = vmatpush3.msra.mxu1 %v328_v48  ;;  %635 = vmatprep.mubr.msk.f32.mxu1 %vm737_vm0, %v736_v12 }
 0x173   :  { %633 = vmatprep.subr.mxu1 %v736_v12 }
 0x174   :  { %634 = vmatpush3.msra.mxu1 %v327_v50 }
 0x175   :  { %636 = vmatmul.mubr.msk.f32.vlgmr.msra.gmra.mxu1 %vm69_vm1, %v35_v33 }
 0x176   :  { %643 = vmatprep.mubr.msk.f32.mxu1 %vm144_vm2, %v39_v45 }
 0x22d   :  { %v623_v53 = vpop.f32.mrf.mxu1 }
 0x22e   :  { %v233_v55 = vadd.f32 %v623_v53, %v867_v52 }
 0x22f   :  { %v227_v56 = vpop.f32.mrf.mxu1 }
 0x230   :  { %v575_v58 = vmul.f32 -1.442695, %v233_v55  ;;  %v228_v59 = vadd.f32 %v227_v56, %v872_v54 }
 0x231   :  { %v626_v60 = vpop.f32.mrf.mxu1 }
 0x232   :  { %657 = vpow2.f32 %v575_v58  ;;  %v574_v62 = vmul.f32 -1.442695, %v228_v59  ;;  %v243_v63 = vadd.f32 %v626_v60, %v878_v57 }
 0x233   :  { %v237_v3 = vpop.f32.mrf.mxu1 }
 0x234   :  { %659 = vpow2.f32 %v574_v62  ;;  %v577_v7 = vmul.f32 -1.442695, %v243_v63  ;;  %v238_v10 = vadd.f32 %v237_v3, %v884_v61 }
 0x235   :  { %v397_v11 = vpop.f32.mrf.mxu1 }
 0x236   :  { %661 = vpow2.f32 %v577_v7  ;;  %v576_v12 = vmul.f32 -1.442695, %v238_v10  ;;  %v398_v16 = vadd.f32 %v397_v11, %v36_v35 }
 0x237   :  { %v637_v20 = vpop.f32.mrf.mxu1 }
 0x238   :  { %663 = vpow2.f32 %v576_v12  ;;  %v401_v23 = vmax.f32 %v398_v16, 0.0 }
 0x23a   :  { %638 = vmatprep.subr.msk.mxu0 %vm157_vm3, %v401_v23  ;;  %646 = vmatprep.subr.msk.mxu1 %vm157_vm3, %v401_v23 }
 0x23b   :  { %639 = vmatpush3.msk.msra.mxu0 %vm157_vm3, %v401_v23  ;;  %647 = vmatpush3.msk.msra.mxu1 %vm157_vm3, %v401_v23 }
 0x23c   :  { %641 = vmatmul.mubr.msk.f32.vlgmr.msra.gmra.mxu0 %vm144_vm2, %v38_v43  ;;  %644 = vmatmul.mubr.msk.f32.vlgmr.msra.gmra.mxu1 %vm144_vm2, %v40_v49 }
 0x23f   :  { %v658_v24 = vpop.eup %657 }
 0x240   :  { %v259_v25 = vadd.f32 1.0, %v658_v24 }
 0x241   :  { %v660_v26 = vpop.eup %659 }
 0x242   :  { %665 = vrcp.f32 %v259_v25  ;;  %v258_v27 = vadd.f32 1.0, %v660_v26 }
 0x243   :  { %v662_v28 = vpop.eup %661 }
 0x244   :  { %667 = vrcp.f32 %v258_v27  ;;  %v261_v29 = vadd.f32 1.0, %v662_v28 }
 0x245   :  { %v664_v30 = vpop.eup %663 }
 0x246   :  { %669 = vrcp.f32 %v261_v29  ;;  %v260_v31 = vadd.f32 1.0, %v664_v30 }
 0x248   :  { %671 = vrcp.f32 %v260_v31 }
 0x24f   :  { %v666_v32 = vpop.eup %665 }
 0x250   :  { %277 = vperm.xlu1 %656, %v666_v32  }
 0x251   :  { %v668_v33 = vpop.eup %667 }
 0x252   :  { %272 = vperm.xlu0 %655, %v668_v33  }
 0x253   :  { %v670_v34 = vpop.eup %669 }
 0x254   :  { %287 = vperm.xlu1 %656, %v670_v34  }
 0x255   :  { %v672_v35 = vpop.eup %671 }
 0x258   :  { %282 = vperm.xlu1 %656, %v672_v35  }
 0x2cb   :  { %v278_v36 = vpop.permute.xlu1 %277 }
 0x2cc   :  { %v292_v37 = vmul.f32 %v278_v36, %v786_v5  ;;  %v293_v38 = vmul.f32 %v278_v36, %v788_v6 }
 0x2cd   :  { %v273_v39 = vpop.permute.xlu0 %272 }
 0x2ce   :  { %300 = vst [vmem:[#allocation5 + $0x10] sm:$0xff] %v292_v37  ;;  %301 = vst [vmem:[#allocation5 + $0x18] sm:$0xff] %v293_v38  ;;  %v290_v40 = vmul.f32 %v273_v39, %v792_v8  ;;  %v291_v41 = vmul.f32 %v273_v39, %v794_v9 }
 0x2cf   :  { %v288_v42 = vpop.permute.xlu1 %287 }
 0x2d0   :  { %298 = vst [vmem:[#allocation5] sm:$0xff] %v290_v40  ;;  %299 = vst [vmem:[#allocation5 + $0x8] sm:$0xff] %v291_v41  ;;  %v296_v43 = vmul.f32 %v288_v42, %v776_v0  ;;  %v297_v44 = vmul.f32 %v288_v42, %v778_v1 }
 0x2d2   :  { %304 = vst [vmem:[#allocation5 + $0x30] sm:$0xff] %v296_v43  ;;  %305 = vst [vmem:[#allocation5 + $0x38] sm:$0xff] %v297_v44 }
 0x2d3   :  { %v283_v45 = vpop.permute.xlu1 %282 }
 0x2d4   :  { %v294_v5 = vmul.f32 %v283_v45, %v780_v2  ;;  %v295_v6 = vmul.f32 %v283_v45, %v784_v4 }
 0x2d6   :  { %302 = vst [vmem:[#allocation5 + $0x20] sm:$0xff] %v294_v5  ;;  %303 = vst [vmem:[#allocation5 + $0x28] sm:$0xff] %v295_v6 }
 0x2fc   :  { %v642_v46 = vpop.f32.mrf.mxu0  ;;  %v645_v8 = vpop.f32.mrf.mxu1 }
 0x2fd   :  { %v477_v9 = vadd.f32 %v642_v46, %v867_v52  ;;  %v487_v51 = vadd.f32 %v645_v8, %v878_v57 }
 0x2fe   :  { %v471_v47 = vpop.f32.mrf.mxu0  ;;  %v481_v48 = vpop.f32.mrf.mxu1 }
 0x2ff   :  { %v585_v49 = vmul.f32 -1.442695, %v477_v9  ;;  %v472_v0 = vadd.f32 %v471_v47, %v872_v54  ;;  %v482_v1 = vadd.f32 %v481_v48, %v884_v61  ;;  %v587_v4 = vmul.f32 -1.442695, %v487_v51 }
 0x301   :  { %673 = vpow2.f32 %v585_v49  ;;  %v584_v50 = vmul.f32 -1.442695, %v472_v0  ;;  %v586_v2 = vmul.f32 -1.442695, %v482_v1 }
 0x303   :  { %675 = vpow2.f32 %v584_v50 }
 0x304   :  { %677 = vpow2.f32 %v586_v2 }
 0x305   :  { %679 = vpow2.f32 %v587_v4 }
 0x30e   :  { %v674_v53 = vpop.eup %673 }
 0x30f   :  { %v503_v55 = vadd.f32 1.0, %v674_v53 }
 0x310   :  { %v676_v56 = vpop.eup %675 }
 0x311   :  { %681 = vrcp.f32 %v503_v55  ;;  %v502_v52 = vadd.f32 1.0, %v676_v56  ;;  %v678_v58 = vpop.eup %677 }
 0x312   :  { %v504_v59 = vadd.f32 1.0, %v678_v58  ;;  %v680_v54 = vpop.eup %679 }
 0x313   :  { %683 = vrcp.f32 %v502_v52  ;;  %v505_v60 = vadd.f32 1.0, %v680_v54 }
 0x314   :  { %685 = vrcp.f32 %v504_v59 }
 0x315   :  { %687 = vrcp.f32 %v505_v60 }
 0x31e   :  { %v682_v61 = vpop.eup %681 }
 0x31f   :  { %521 = vperm.xlu1 %656, %v682_v61  }
 0x320   :  { %v684_v57 = vpop.eup %683 }
 0x321   :  { %v686_v62 = vpop.eup %685 }
 0x322   :  { %v688_v63 = vpop.eup %687 }
 0x323   :  { %516 = vperm.xlu1 %656, %v684_v57  }
 0x327   :  { %526 = vperm.xlu1 %656, %v686_v62  }
 0x32b   :  { %531 = vperm.xlu1 %656, %v688_v63  }
 0x39a   :  { %v522_v3 = vpop.permute.xlu1 %521 }
 0x39b   :  { %v536_v7 = vmul.f32 %v522_v3, %v813_v18  ;;  %v537_v10 = vmul.f32 %v522_v3, %v815_v19 }
 0x39d   :  { %545 = vst [vmem:[#allocation5 + $0x50] sm:$0xff] %v536_v7  ;;  %546 = vst [vmem:[#allocation5 + $0x58] sm:$0xff] %v537_v10 }
 0x39e   :  { %v517_v11 = vpop.permute.xlu1 %516 }
 0x39f   :  { %v534_v12 = vmul.f32 %v517_v11, %v819_v21  ;;  %v535_v16 = vmul.f32 %v517_v11, %v821_v22 }
 0x3a1   :  { %543 = vst [vmem:[#allocation5 + $0x40] sm:$0xff] %v534_v12  ;;  %544 = vst [vmem:[#allocation5 + $0x48] sm:$0xff] %v535_v16 }
 0x3a2   :  { %v527_v20 = vpop.permute.xlu1 %526 }
 0x3a3   :  { %v538_v23 = vmul.f32 %v527_v20, %v807_v15  ;;  %v539_v24 = vmul.f32 %v527_v20, %v811_v17 }
 0x3a5   :  { %547 = vst [vmem:[#allocation5 + $0x60] sm:$0xff] %v538_v23  ;;  %548 = vst [vmem:[#allocation5 + $0x68] sm:$0xff] %v539_v24 }
 0x3a6   :  { %v532_v18 = vpop.permute.xlu1 %531 }
 0x3a7   :  { %v540_v19 = vmul.f32 %v532_v18, %v803_v13  ;;  %v541_v25 = vmul.f32 %v532_v18, %v805_v14 }
 0x3a9   :  { %549 = vst [vmem:[#allocation5 + $0x70] sm:$0xff] %v540_v19  ;;  %550 = vst [vmem:[#allocation5 + $0x78] sm:$0xff] %v541_v25 }
 0x3aa   :  { %720 = shalt.err (!%p717_p9)
}
 0x3ab   :  { %562 = dma.vmem_to_hbm [thread:$0]  %s557_s16, 2048, %s925_s5, [#allocation4], %s734_s21, %s734_s21, %s735_s22  }
 0x3ac   :  { %731 = dma.done.wait [#allocation4], 2048  }
 0x3ad   :  { %732 = vsyncadd [#allocation4], 4294965248 }
 0x3ae   :  { %566 = vsyncpa [#allocation3], 1 }
 0x3af   :  { %567 = vsyncpa [#allocation4], 1 }

</bundles_post_ra>
